<compile_context>
chip_gen: v7x
topology: tpu7x:2x2x1
jax: 0.10.0
libtpu: 0.0.40
codegen_flags: <defaults>
</compile_context>

<pallas_src>
import functools

import jax
import jax.numpy as jnp
import numpy as np
from jax import lax
from jax.experimental import pallas as pl
from jax.experimental.pallas import tpu as pltpu


def _lstm_kernel(x_ref, wih_ref, whh_ref, b_ref, wlin_ref, out_ref, gx_sc,
                 *, seq_len, batch_tile, hidden):
    """One batch-tile: full layer-0 LSTM recurrence + final linear.

    x_ref:    (S*BT, N)   this tile's input, time-major, batch-tile flattened
    wih_ref:  (N, 4H)     input weights, gate-permuted [i,f,o,g], right-mult
    whh_ref:  (H, 4H)     recurrent weights, gate-permuted, right-mult
    b_ref:    (1, 4H)     b_ih + b_hh, gate-permuted
    wlin_ref: (1, H)      final projection weight (module uses bias=False)
    out_ref:  (1, 1, BT)  lane-dense output row for this tile
    gx_sc:    (S*BT, 4H)  VMEM scratch for the hoisted input projection
    """
    S, BT, H = seq_len, batch_tile, hidden

    # Hoisted batched input projection (off the serial path), bias folded in:
    #   Gx = x @ w_ih_T + b   for all S*BT rows in a single MXU pass.
    gx_sc[...] = (
        jnp.dot(x_ref[...], wih_ref[...], preferred_element_type=jnp.float32)
        + b_ref[...]
    )

    w_hh = whh_ref[...]  # (H, 4H) — held across the recurrence

    def step(t, carry):
        h, c = carry
        row = pl.multiple_of(t * BT, BT)            # aligned dynamic slice
        gx_t = gx_sc[pl.ds(row, BT), :]             # (BT, 4H)

        # Single small matmul on the serial critical path.
        gates = gx_t + jnp.dot(h, w_hh, preferred_element_type=jnp.float32)

        # Gate-permuted layout [i, f, o, g]: one sigmoid over lanes 0:3H,
        # one tanh over lanes 3H:4H (instead of 2 full-width EUP passes).
        sg = jax.nn.sigmoid(gates[:, :3 * H])
        i_g = sg[:, 0 * H:1 * H]
        f_g = sg[:, 1 * H:2 * H]
        o_g = sg[:, 2 * H:3 * H]
        g_g = jnp.tanh(gates[:, 3 * H:4 * H])

        c_new = f_g * c + i_g * g_g
        h_new = o_g * jnp.tanh(c_new)
        return h_new, c_new

    h0 = jnp.zeros((BT, H), jnp.float32)
    c0 = jnp.zeros((BT, H), jnp.float32)
    # Bounded unroll: full scheduler visibility for small S without blowing
    # the 64-vreg file when S is large.
    h_last, _ = lax.fori_loop(0, S, step, (h0, c0), unroll=min(S, 8))

    # Final projection emitted lane-dense: (1,H) x (BT,H) contracted on H
    # -> (1, BT); batch lives on the 128-lane axis (no column-shaped store).
    res = lax.dot_general(wlin_ref[...], h_last,
                          (((1,), (1,)), ((), ())),
                          preferred_element_type=jnp.float32)
    out_ref[0] = res


def _compute_vmem_limit(S, BT, N, H):
    f32 = 4
    need = f32 * (
        2 * S * BT * N                 # x tile (double-buffered)
        + S * BT * 4 * H               # Gx scratch
        + 2 * (N * 4 * H + H * 4 * H + 4 * H + H)   # weights/bias
        + 2 * BT                       # output
    )
    return int(min(max(2 * need, 16 * 1024 * 1024), 100 * 1024 * 1024))


def shallow_regression_lstm_forward(x, w_ih, w_hh, b_ih, b_hh, w_lin,
                                    max_batch_tile=128):
    """x: (batch, seq, num_sensors); weights in PyTorch layout:
       w_ih: (4H, num_sensors), w_hh: (4H, H), b_ih/b_hh: (4H,), w_lin: (1, H).
       Returns (batch,) float32 == linear(hn[0]).flatten() with bias=False."""
    B, S, N = x.shape
    H = w_hh.shape[1]

    # Batch tile: multiple of the 8-sublane tile, capped so state fits the MXU
    # height comfortably on all generations; grid over tiles (parallel).
    BT = min(((B + 7) // 8) * 8, max_batch_tile)
    num_tiles = -(-B // BT)
    Bp_total = num_tiles * BT

    # Glue: pad batch, arrange per-tile time-major, flatten rows.
    x_pad = x.astype(jnp.float32)
    if Bp_total != B:
        x_pad = jnp.pad(x_pad, ((0, Bp_total - B), (0, 0), (0, 0)))
    x_tiles = x_pad.reshape(num_tiles, BT, S, N).transpose(0, 2, 1, 3)
    x_flat = x_tiles.reshape(num_tiles * S * BT, N)              # (T*S*BT, N)

    # Gate-column permutation: PyTorch [i, f, g, o] -> kernel [i, f, o, g]
    # so sigmoid gates are contiguous in lanes 0:3H and tanh gate in 3H:4H.
    perm = np.concatenate([np.arange(0, H), np.arange(H, 2 * H),
                           np.arange(3 * H, 4 * H), np.arange(2 * H, 3 * H)])
    w_ih_T = jnp.transpose(w_ih).astype(jnp.float32)[:, perm]    # (N, 4H)
    w_hh_T = jnp.transpose(w_hh).astype(jnp.float32)[:, perm]    # (H, 4H)
    bias = (b_ih + b_hh).astype(jnp.float32)[perm].reshape(1, 4 * H)
    w_lin_r = w_lin.astype(jnp.float32).reshape(1, H)            # (1, H)

    kernel = functools.partial(_lstm_kernel, seq_len=S, batch_tile=BT,
                               hidden=H)

    out = pl.pallas_call(
        kernel,
        out_shape=jax.ShapeDtypeStruct((num_tiles, 1, BT), jnp.float32),
        grid_spec=pltpu.PrefetchScalarGridSpec(
            num_scalar_prefetch=0,
            grid=(num_tiles,),
            in_specs=[
                pl.BlockSpec((S * BT, N), lambda b: (b, 0)),     # x tile
                pl.BlockSpec((N, 4 * H), lambda b: (0, 0)),      # w_ih_T
                pl.BlockSpec((H, 4 * H), lambda b: (0, 0)),      # w_hh_T
                pl.BlockSpec((1, 4 * H), lambda b: (0, 0)),      # bias
                pl.BlockSpec((1, H), lambda b: (0, 0)),          # w_lin
            ],
            out_specs=pl.BlockSpec((1, 1, BT), lambda b: (b, 0, 0)),
            scratch_shapes=[
                pltpu.VMEM((S * BT, 4 * H), jnp.float32),        # hoisted Gx
            ],
        ),
        compiler_params=pltpu.CompilerParams(
            dimension_semantics=("parallel",),   # batch tiles are independent
            vmem_limit_bytes=_compute_vmem_limit(S, BT, N, H),
        ),
    )(x_flat, w_ih_T, w_hh_T, bias, w_lin_r)

    return out.reshape(Bp_total)[:B]  # drop batch padding; == .flatten()


def _ref_forward(x, w_ih, w_hh, b_ih, b_hh, w_lin):
    """Pure-JAX reference of the same forward pass (layer 0 + bias-free linear),
    using the ORIGINAL PyTorch gate order (validates the kernel's permutation)."""
    B, S, N = x.shape
    H = w_hh.shape[1]
    w_ih_T = w_ih.T
    w_hh_T = w_hh.T
    bias = b_ih + b_hh

    def step(carry, x_t):
        h, c = carry
        gates = x_t @ w_ih_T + h @ w_hh_T + bias
        i = jax.nn.sigmoid(gates[:, 0 * H:1 * H])
        f = jax.nn.sigmoid(gates[:, 1 * H:2 * H])
        g = jnp.tanh(gates[:, 2 * H:3 * H])
        o = jax.nn.sigmoid(gates[:, 3 * H:4 * H])
        c = f * c + i * g
        h = o * jnp.tanh(c)
        return (h, c), None

    init = (jnp.zeros((B, H), jnp.float32), jnp.zeros((B, H), jnp.float32))
    (h_last, _), _ = jax.lax.scan(step, init, jnp.transpose(x, (1, 0, 2)))
    return (h_last @ w_lin.T).reshape(-1)


if __name__ == "__main__":
    # Small, LSTM-consistent shapes.
    batch = 2
    seq = 8
    num_sensors = 4
    hidden_units = 32
    num_layers = 2  # only hn[0] is used downstream; layer 0 determines out

    key = jax.random.PRNGKey(0)
    kx, k1, k2, k3, k4, k5 = jax.random.split(key, 6)

    # Deterministic parameter init (PyTorch uses U(-1/sqrt(H), 1/sqrt(H))).
    bound = 1.0 / np.sqrt(hidden_units)
    x = jax.random.normal(kx, (batch, seq, num_sensors), dtype=jnp.float32)
    w_ih = jax.random.uniform(k1, (4 * hidden_units, num_sensors),
                              minval=-bound, maxval=bound, dtype=jnp.float32)
    w_hh = jax.random.uniform(k2, (4 * hidden_units, hidden_units),
                              minval=-bound, maxval=bound, dtype=jnp.float32)
    b_ih = jax.random.uniform(k3, (4 * hidden_units,),
                              minval=-bound, maxval=bound, dtype=jnp.float32)
    b_hh = jax.random.uniform(k4, (4 * hidden_units,),
                              minval=-bound, maxval=bound, dtype=jnp.float32)
    w_lin = jax.random.uniform(k5, (1, hidden_units),
                               minval=-bound, maxval=bound, dtype=jnp.float32)
    # TODO(synk): layer-1..N-1 LSTM weights exist in the PyTorch module but do
    # not affect the returned output (hn[0]); they are intentionally omitted.

    out = shallow_regression_lstm_forward(x, w_ih, w_hh, b_ih, b_hh, w_lin)
    out = jax.block_until_ready(out)

    ref = _ref_forward(x, w_ih, w_hh, b_ih, b_hh, w_lin)
    np.testing.assert_allclose(np.asarray(out), np.asarray(ref),
                               rtol=1e-5, atol=1e-5)
    assert out.shape == (batch,)
    print("KERNEL_OK")
</pallas_src>

<mosaic_0001>
module attributes {stable_mosaic.version = 11 : i64} {
  func.func @_lstm_kernel(%arg0: i32, %arg1: memref<64x4xf32, #tpu.memory_space<vmem>>, %arg2: memref<4x128xf32, #tpu.memory_space<vmem>>, %arg3: memref<32x128xf32, #tpu.memory_space<vmem>>, %arg4: memref<1x128xf32, #tpu.memory_space<vmem>>, %arg5: memref<1x32xf32, #tpu.memory_space<vmem>>, %arg6: memref<1x1x8xf32, #tpu.memory_space<vmem>>, %arg7: memref<64x128xf32, #tpu.memory_space<vmem>>) attributes {dimension_semantics = [#tpu.dimension_semantics<parallel>], iteration_bounds = array<i64: 1>, scalar_prefetch = 0 : i64, scratch_operands = 1 : i64, tpu.core_type = #tpu.core_type<tc>, window_params = [{transform_indices = @transform_0, window_bounds = array<i64: 64, 4>}, {pipeline_mode = #tpu.pipeline_mode<synchronous>, transform_indices = @transform_1, window_bounds = array<i64: 4, 128>}, {pipeline_mode = #tpu.pipeline_mode<synchronous>, transform_indices = @transform_2, window_bounds = array<i64: 32, 128>}, {pipeline_mode = #tpu.pipeline_mode<synchronous>, transform_indices = @transform_3, window_bounds = array<i64: 1, 128>}, {pipeline_mode = #tpu.pipeline_mode<synchronous>, transform_indices = @transform_4, window_bounds = array<i64: 1, 32>}, {transform_indices = @transform_5, window_bounds = array<i64: 1, 1, 8>}]} {
    %c0 = arith.constant 0 : index
    %c0_0 = arith.constant 0 : index
    %0 = vector.load %arg1[%c0, %c0_0] : memref<64x4xf32, #tpu.memory_space<vmem>>, vector<64x4xf32>
    %c0_1 = arith.constant 0 : index
    %c0_2 = arith.constant 0 : index
    %1 = vector.load %arg2[%c0_1, %c0_2] : memref<4x128xf32, #tpu.memory_space<vmem>>, vector<4x128xf32>
    %cst = arith.constant dense<0.000000e+00> : vector<64x128xf32>
    %2 = tpu.matmul %0, %1, %cst {dimension_numbers = #tpu.dot_dimension_numbers<[1], [0], [0], [1], [0, 0, 1, 1], [], []>} : vector<64x4xf32>, vector<4x128xf32>, vector<64x128xf32> -> vector<64x128xf32>
    %c0_3 = arith.constant 0 : index
    %c0_4 = arith.constant 0 : index
    %3 = vector.load %arg4[%c0_3, %c0_4] : memref<1x128xf32, #tpu.memory_space<vmem>>, vector<1x128xf32>
    %4 = vector.broadcast %3 : vector<1x128xf32> to vector<64x128xf32>
    %5 = arith.addf %2, %4 : vector<64x128xf32>
    %c0_5 = arith.constant 0 : index
    %c0_6 = arith.constant 0 : index
    %6 = vector.load %arg7[%c0_5, %c0_6] : memref<64x128xf32, #tpu.memory_space<vmem>>, vector<64x128xf32>
    tpu.vector_store %arg7[%c0_5, %c0_6], %5 {strides = array<i32>} : memref<64x128xf32, #tpu.memory_space<vmem>>, vector<64x128xf32>,
    %c0_7 = arith.constant 0 : index
    %c0_8 = arith.constant 0 : index
    %7 = vector.load %arg3[%c0_7, %c0_8] : memref<32x128xf32, #tpu.memory_space<vmem>>, vector<32x128xf32>
    %cst_9 = arith.constant 0.000000e+00 : f32
    %8 = vector.broadcast %cst_9 : f32 to vector<8x32xf32>
    %cst_10 = arith.constant 0.000000e+00 : f32
    %9 = vector.broadcast %cst_10 : f32 to vector<8x32xf32>
    %c0_i32 = arith.constant 0 : i32
    %c8_i32 = arith.constant 8 : i32
    %10 = arith.muli %c0_i32, %c8_i32 : i32
    %11 = tpu.assume_multiple %10, 8 : i32
    %12 = arith.index_cast %11 : i32 to index
    %c0_11 = arith.constant 0 : index
    %13 = vector.load %arg7[%12, %c0_11] : memref<64x128xf32, #tpu.memory_space<vmem>>, vector<8x128xf32>
    %cst_12 = arith.constant dense<0.000000e+00> : vector<8x128xf32>
    %14 = tpu.matmul %8, %7, %cst_12 {dimension_numbers = #tpu.dot_dimension_numbers<[1], [0], [0], [1], [0, 0, 1, 1], [], []>} : vector<8x32xf32>, vector<32x128xf32>, vector<8x128xf32> -> vector<8x128xf32>
    %15 = arith.addf %13, %14 : vector<8x128xf32>
    %16 = vector.extract_strided_slice %15 {offsets = [0, 0], sizes = [8, 96], strides = [1, 1]} : vector<8x128xf32> to vector<8x96xf32>
    %17 = arith.negf %16 : vector<8x96xf32>
    %18 = math.exp %17 : vector<8x96xf32>
    %cst_13 = arith.constant 1.000000e+00 : f32
    %19 = vector.broadcast %cst_13 : f32 to vector<8x96xf32>
    %20 = arith.addf %19, %18 : vector<8x96xf32>
    %21 = arith.divf %19, %20 : vector<8x96xf32>
    %22 = vector.extract_strided_slice %21 {offsets = [0, 0], sizes = [8, 32], strides = [1, 1]} : vector<8x96xf32> to vector<8x32xf32>
    %23 = vector.extract_strided_slice %21 {offsets = [0, 32], sizes = [8, 32], strides = [1, 1]} : vector<8x96xf32> to vector<8x32xf32>
    %24 = vector.extract_strided_slice %21 {offsets = [0, 64], sizes = [8, 32], strides = [1, 1]} : vector<8x96xf32> to vector<8x32xf32>
    %25 = vector.extract_strided_slice %15 {offsets = [0, 96], sizes = [8, 32], strides = [1, 1]} : vector<8x128xf32> to vector<8x32xf32>
    %26 = math.tanh %25 : vector<8x32xf32>
    %27 = arith.mulf %23, %9 : vector<8x32xf32>
    %28 = arith.mulf %22, %26 : vector<8x32xf32>
    %29 = arith.addf %27, %28 : vector<8x32xf32>
    %30 = math.tanh %29 : vector<8x32xf32>
    %31 = arith.mulf %24, %30 : vector<8x32xf32>
    %c1_i32 = arith.constant 1 : i32
    %c8_i32_14 = arith.constant 8 : i32
    %32 = arith.muli %c1_i32, %c8_i32_14 : i32
    %33 = tpu.assume_multiple %32, 8 : i32
    %34 = arith.index_cast %33 : i32 to index
    %c0_15 = arith.constant 0 : index
    %35 = vector.load %arg7[%34, %c0_15] : memref<64x128xf32, #tpu.memory_space<vmem>>, vector<8x128xf32>
    %cst_16 = arith.constant dense<0.000000e+00> : vector<8x128xf32>
    %36 = tpu.matmul %31, %7, %cst_16 {dimension_numbers = #tpu.dot_dimension_numbers<[1], [0], [0], [1], [0, 0, 1, 1], [], []>} : vector<8x32xf32>, vector<32x128xf32>, vector<8x128xf32> -> vector<8x128xf32>
    %37 = arith.addf %35, %36 : vector<8x128xf32>
    %38 = vector.extract_strided_slice %37 {offsets = [0, 0], sizes = [8, 96], strides = [1, 1]} : vector<8x128xf32> to vector<8x96xf32>
    %39 = arith.negf %38 : vector<8x96xf32>
    %40 = math.exp %39 : vector<8x96xf32>
    %cst_17 = arith.constant 1.000000e+00 : f32
    %41 = vector.broadcast %cst_17 : f32 to vector<8x96xf32>
    %42 = arith.addf %41, %40 : vector<8x96xf32>
    %43 = arith.divf %41, %42 : vector<8x96xf32>
    %44 = vector.extract_strided_slice %43 {offsets = [0, 0], sizes = [8, 32], strides = [1, 1]} : vector<8x96xf32> to vector<8x32xf32>
    %45 = vector.extract_strided_slice %43 {offsets = [0, 32], sizes = [8, 32], strides = [1, 1]} : vector<8x96xf32> to vector<8x32xf32>
    %46 = vector.extract_strided_slice %43 {offsets = [0, 64], sizes = [8, 32], strides = [1, 1]} : vector<8x96xf32> to vector<8x32xf32>
    %47 = vector.extract_strided_slice %37 {offsets = [0, 96], sizes = [8, 32], strides = [1, 1]} : vector<8x128xf32> to vector<8x32xf32>
    %48 = math.tanh %47 : vector<8x32xf32>
    %49 = arith.mulf %45, %29 : vector<8x32xf32>
    %50 = arith.mulf %44, %48 : vector<8x32xf32>
    %51 = arith.addf %49, %50 : vector<8x32xf32>
    %52 = math.tanh %51 : vector<8x32xf32>
    %53 = arith.mulf %46, %52 : vector<8x32xf32>
    %c2_i32 = arith.constant 2 : i32
    %c8_i32_18 = arith.constant 8 : i32
    %54 = arith.muli %c2_i32, %c8_i32_18 : i32
    %55 = tpu.assume_multiple %54, 8 : i32
    %56 = arith.index_cast %55 : i32 to index
    %c0_19 = arith.constant 0 : index
    %57 = vector.load %arg7[%56, %c0_19] : memref<64x128xf32, #tpu.memory_space<vmem>>, vector<8x128xf32>
    %cst_20 = arith.constant dense<0.000000e+00> : vector<8x128xf32>
    %58 = tpu.matmul %53, %7, %cst_20 {dimension_numbers = #tpu.dot_dimension_numbers<[1], [0], [0], [1], [0, 0, 1, 1], [], []>} : vector<8x32xf32>, vector<32x128xf32>, vector<8x128xf32> -> vector<8x128xf32>
    %59 = arith.addf %57, %58 : vector<8x128xf32>
    %60 = vector.extract_strided_slice %59 {offsets = [0, 0], sizes = [8, 96], strides = [1, 1]} : vector<8x128xf32> to vector<8x96xf32>
    %61 = arith.negf %60 : vector<8x96xf32>
    %62 = math.exp %61 : vector<8x96xf32>
    %cst_21 = arith.constant 1.000000e+00 : f32
    %63 = vector.broadcast %cst_21 : f32 to vector<8x96xf32>
    %64 = arith.addf %63, %62 : vector<8x96xf32>
    %65 = arith.divf %63, %64 : vector<8x96xf32>
    %66 = vector.extract_strided_slice %65 {offsets = [0, 0], sizes = [8, 32], strides = [1, 1]} : vector<8x96xf32> to vector<8x32xf32>
    %67 = vector.extract_strided_slice %65 {offsets = [0, 32], sizes = [8, 32], strides = [1, 1]} : vector<8x96xf32> to vector<8x32xf32>
    %68 = vector.extract_strided_slice %65 {offsets = [0, 64], sizes = [8, 32], strides = [1, 1]} : vector<8x96xf32> to vector<8x32xf32>
    %69 = vector.extract_strided_slice %59 {offsets = [0, 96], sizes = [8, 32], strides = [1, 1]} : vector<8x128xf32> to vector<8x32xf32>
    %70 = math.tanh %69 : vector<8x32xf32>
    %71 = arith.mulf %67, %51 : vector<8x32xf32>
    %72 = arith.mulf %66, %70 : vector<8x32xf32>
    %73 = arith.addf %71, %72 : vector<8x32xf32>
    %74 = math.tanh %73 : vector<8x32xf32>
    %75 = arith.mulf %68, %74 : vector<8x32xf32>
    %c3_i32 = arith.constant 3 : i32
    %c8_i32_22 = arith.constant 8 : i32
    %76 = arith.muli %c3_i32, %c8_i32_22 : i32
    %77 = tpu.assume_multiple %76, 8 : i32
    %78 = arith.index_cast %77 : i32 to index
    %c0_23 = arith.constant 0 : index
    %79 = vector.load %arg7[%78, %c0_23] : memref<64x128xf32, #tpu.memory_space<vmem>>, vector<8x128xf32>
    %cst_24 = arith.constant dense<0.000000e+00> : vector<8x128xf32>
    %80 = tpu.matmul %75, %7, %cst_24 {dimension_numbers = #tpu.dot_dimension_numbers<[1], [0], [0], [1], [0, 0, 1, 1], [], []>} : vector<8x32xf32>, vector<32x128xf32>, vector<8x128xf32> -> vector<8x128xf32>
    %81 = arith.addf %79, %80 : vector<8x128xf32>
    %82 = vector.extract_strided_slice %81 {offsets = [0, 0], sizes = [8, 96], strides = [1, 1]} : vector<8x128xf32> to vector<8x96xf32>
    %83 = arith.negf %82 : vector<8x96xf32>
    %84 = math.exp %83 : vector<8x96xf32>
    %cst_25 = arith.constant 1.000000e+00 : f32
    %85 = vector.broadcast %cst_25 : f32 to vector<8x96xf32>
    %86 = arith.addf %85, %84 : vector<8x96xf32>
    %87 = arith.divf %85, %86 : vector<8x96xf32>
    %88 = vector.extract_strided_slice %87 {offsets = [0, 0], sizes = [8, 32], strides = [1, 1]} : vector<8x96xf32> to vector<8x32xf32>
    %89 = vector.extract_strided_slice %87 {offsets = [0, 32], sizes = [8, 32], strides = [1, 1]} : vector<8x96xf32> to vector<8x32xf32>
    %90 = vector.extract_strided_slice %87 {offsets = [0, 64], sizes = [8, 32], strides = [1, 1]} : vector<8x96xf32> to vector<8x32xf32>
    %91 = vector.extract_strided_slice %81 {offsets = [0, 96], sizes = [8, 32], strides = [1, 1]} : vector<8x128xf32> to vector<8x32xf32>
    %92 = math.tanh %91 : vector<8x32xf32>
    %93 = arith.mulf %89, %73 : vector<8x32xf32>
    %94 = arith.mulf %88, %92 : vector<8x32xf32>
    %95 = arith.addf %93, %94 : vector<8x32xf32>
    %96 = math.tanh %95 : vector<8x32xf32>
    %97 = arith.mulf %90, %96 : vector<8x32xf32>
    %c4_i32 = arith.constant 4 : i32
    %c8_i32_26 = arith.constant 8 : i32
    %98 = arith.muli %c4_i32, %c8_i32_26 : i32
    %99 = tpu.assume_multiple %98, 8 : i32
    %100 = arith.index_cast %99 : i32 to index
    %c0_27 = arith.constant 0 : index
    %101 = vector.load %arg7[%100, %c0_27] : memref<64x128xf32, #tpu.memory_space<vmem>>, vector<8x128xf32>
    %cst_28 = arith.constant dense<0.000000e+00> : vector<8x128xf32>
    %102 = tpu.matmul %97, %7, %cst_28 {dimension_numbers = #tpu.dot_dimension_numbers<[1], [0], [0], [1], [0, 0, 1, 1], [], []>} : vector<8x32xf32>, vector<32x128xf32>, vector<8x128xf32> -> vector<8x128xf32>
    %103 = arith.addf %101, %102 : vector<8x128xf32>
    %104 = vector.extract_strided_slice %103 {offsets = [0, 0], sizes = [8, 96], strides = [1, 1]} : vector<8x128xf32> to vector<8x96xf32>
    %105 = arith.negf %104 : vector<8x96xf32>
    %106 = math.exp %105 : vector<8x96xf32>
    %cst_29 = arith.constant 1.000000e+00 : f32
    %107 = vector.broadcast %cst_29 : f32 to vector<8x96xf32>
    %108 = arith.addf %107, %106 : vector<8x96xf32>
    %109 = arith.divf %107, %108 : vector<8x96xf32>
    %110 = vector.extract_strided_slice %109 {offsets = [0, 0], sizes = [8, 32], strides = [1, 1]} : vector<8x96xf32> to vector<8x32xf32>
    %111 = vector.extract_strided_slice %109 {offsets = [0, 32], sizes = [8, 32], strides = [1, 1]} : vector<8x96xf32> to vector<8x32xf32>
    %112 = vector.extract_strided_slice %109 {offsets = [0, 64], sizes = [8, 32], strides = [1, 1]} : vector<8x96xf32> to vector<8x32xf32>
    %113 = vector.extract_strided_slice %103 {offsets = [0, 96], sizes = [8, 32], strides = [1, 1]} : vector<8x128xf32> to vector<8x32xf32>
    %114 = math.tanh %113 : vector<8x32xf32>
    %115 = arith.mulf %111, %95 : vector<8x32xf32>
    %116 = arith.mulf %110, %114 : vector<8x32xf32>
    %117 = arith.addf %115, %116 : vector<8x32xf32>
    %118 = math.tanh %117 : vector<8x32xf32>
    %119 = arith.mulf %112, %118 : vector<8x32xf32>
    %c5_i32 = arith.constant 5 : i32
    %c8_i32_30 = arith.constant 8 : i32
    %120 = arith.muli %c5_i32, %c8_i32_30 : i32
    %121 = tpu.assume_multiple %120, 8 : i32
    %122 = arith.index_cast %121 : i32 to index
    %c0_31 = arith.constant 0 : index
    %123 = vector.load %arg7[%122, %c0_31] : memref<64x128xf32, #tpu.memory_space<vmem>>, vector<8x128xf32>
    %cst_32 = arith.constant dense<0.000000e+00> : vector<8x128xf32>
    %124 = tpu.matmul %119, %7, %cst_32 {dimension_numbers = #tpu.dot_dimension_numbers<[1], [0], [0], [1], [0, 0, 1, 1], [], []>} : vector<8x32xf32>, vector<32x128xf32>, vector<8x128xf32> -> vector<8x128xf32>
    %125 = arith.addf %123, %124 : vector<8x128xf32>
    %126 = vector.extract_strided_slice %125 {offsets = [0, 0], sizes = [8, 96], strides = [1, 1]} : vector<8x128xf32> to vector<8x96xf32>
    %127 = arith.negf %126 : vector<8x96xf32>
    %128 = math.exp %127 : vector<8x96xf32>
    %cst_33 = arith.constant 1.000000e+00 : f32
    %129 = vector.broadcast %cst_33 : f32 to vector<8x96xf32>
    %130 = arith.addf %129, %128 : vector<8x96xf32>
    %131 = arith.divf %129, %130 : vector<8x96xf32>
    %132 = vector.extract_strided_slice %131 {offsets = [0, 0], sizes = [8, 32], strides = [1, 1]} : vector<8x96xf32> to vector<8x32xf32>
    %133 = vector.extract_strided_slice %131 {offsets = [0, 32], sizes = [8, 32], strides = [1, 1]} : vector<8x96xf32> to vector<8x32xf32>
    %134 = vector.extract_strided_slice %131 {offsets = [0, 64], sizes = [8, 32], strides = [1, 1]} : vector<8x96xf32> to vector<8x32xf32>
    %135 = vector.extract_strided_slice %125 {offsets = [0, 96], sizes = [8, 32], strides = [1, 1]} : vector<8x128xf32> to vector<8x32xf32>
    %136 = math.tanh %135 : vector<8x32xf32>
    %137 = arith.mulf %133, %117 : vector<8x32xf32>
    %138 = arith.mulf %132, %136 : vector<8x32xf32>
    %139 = arith.addf %137, %138 : vector<8x32xf32>
    %140 = math.tanh %139 : vector<8x32xf32>
    %141 = arith.mulf %134, %140 : vector<8x32xf32>
    %c6_i32 = arith.constant 6 : i32
    %c8_i32_34 = arith.constant 8 : i32
    %142 = arith.muli %c6_i32, %c8_i32_34 : i32
    %143 = tpu.assume_multiple %142, 8 : i32
    %144 = arith.index_cast %143 : i32 to index
    %c0_35 = arith.constant 0 : index
    %145 = vector.load %arg7[%144, %c0_35] : memref<64x128xf32, #tpu.memory_space<vmem>>, vector<8x128xf32>
    %cst_36 = arith.constant dense<0.000000e+00> : vector<8x128xf32>
    %146 = tpu.matmul %141, %7, %cst_36 {dimension_numbers = #tpu.dot_dimension_numbers<[1], [0], [0], [1], [0, 0, 1, 1], [], []>} : vector<8x32xf32>, vector<32x128xf32>, vector<8x128xf32> -> vector<8x128xf32>
    %147 = arith.addf %145, %146 : vector<8x128xf32>
    %148 = vector.extract_strided_slice %147 {offsets = [0, 0], sizes = [8, 96], strides = [1, 1]} : vector<8x128xf32> to vector<8x96xf32>
    %149 = arith.negf %148 : vector<8x96xf32>
    %150 = math.exp %149 : vector<8x96xf32>
    %cst_37 = arith.constant 1.000000e+00 : f32
    %151 = vector.broadcast %cst_37 : f32 to vector<8x96xf32>
    %152 = arith.addf %151, %150 : vector<8x96xf32>
    %153 = arith.divf %151, %152 : vector<8x96xf32>
    %154 = vector.extract_strided_slice %153 {offsets = [0, 0], sizes = [8, 32], strides = [1, 1]} : vector<8x96xf32> to vector<8x32xf32>
    %155 = vector.extract_strided_slice %153 {offsets = [0, 32], sizes = [8, 32], strides = [1, 1]} : vector<8x96xf32> to vector<8x32xf32>
    %156 = vector.extract_strided_slice %153 {offsets = [0, 64], sizes = [8, 32], strides = [1, 1]} : vector<8x96xf32> to vector<8x32xf32>
    %157 = vector.extract_strided_slice %147 {offsets = [0, 96], sizes = [8, 32], strides = [1, 1]} : vector<8x128xf32> to vector<8x32xf32>
    %158 = math.tanh %157 : vector<8x32xf32>
    %159 = arith.mulf %155, %139 : vector<8x32xf32>
    %160 = arith.mulf %154, %158 : vector<8x32xf32>
    %161 = arith.addf %159, %160 : vector<8x32xf32>
    %162 = math.tanh %161 : vector<8x32xf32>
    %163 = arith.mulf %156, %162 : vector<8x32xf32>
    %c7_i32 = arith.constant 7 : i32
    %c8_i32_38 = arith.constant 8 : i32
    %164 = arith.muli %c7_i32, %c8_i32_38 : i32
    %165 = tpu.assume_multiple %164, 8 : i32
    %166 = arith.index_cast %165 : i32 to index
    %c0_39 = arith.constant 0 : index
    %167 = vector.load %arg7[%166, %c0_39] : memref<64x128xf32, #tpu.memory_space<vmem>>, vector<8x128xf32>
    %cst_40 = arith.constant dense<0.000000e+00> : vector<8x128xf32>
    %168 = tpu.matmul %163, %7, %cst_40 {dimension_numbers = #tpu.dot_dimension_numbers<[1], [0], [0], [1], [0, 0, 1, 1], [], []>} : vector<8x32xf32>, vector<32x128xf32>, vector<8x128xf32> -> vector<8x128xf32>
    %169 = arith.addf %167, %168 : vector<8x128xf32>
    %170 = vector.extract_strided_slice %169 {offsets = [0, 0], sizes = [8, 96], strides = [1, 1]} : vector<8x128xf32> to vector<8x96xf32>
    %171 = arith.negf %170 : vector<8x96xf32>
    %172 = math.exp %171 : vector<8x96xf32>
    %cst_41 = arith.constant 1.000000e+00 : f32
    %173 = vector.broadcast %cst_41 : f32 to vector<8x96xf32>
    %174 = arith.addf %173, %172 : vector<8x96xf32>
    %175 = arith.divf %173, %174 : vector<8x96xf32>
    %176 = vector.extract_strided_slice %175 {offsets = [0, 0], sizes = [8, 32], strides = [1, 1]} : vector<8x96xf32> to vector<8x32xf32>
    %177 = vector.extract_strided_slice %175 {offsets = [0, 32], sizes = [8, 32], strides = [1, 1]} : vector<8x96xf32> to vector<8x32xf32>
    %178 = vector.extract_strided_slice %175 {offsets = [0, 64], sizes = [8, 32], strides = [1, 1]} : vector<8x96xf32> to vector<8x32xf32>
    %179 = vector.extract_strided_slice %169 {offsets = [0, 96], sizes = [8, 32], strides = [1, 1]} : vector<8x128xf32> to vector<8x32xf32>
    %180 = math.tanh %179 : vector<8x32xf32>
    %181 = arith.mulf %177, %161 : vector<8x32xf32>
    %182 = arith.mulf %176, %180 : vector<8x32xf32>
    %183 = arith.addf %181, %182 : vector<8x32xf32>
    %184 = math.tanh %183 : vector<8x32xf32>
    %185 = arith.mulf %178, %184 : vector<8x32xf32>
    %c8_i32_42 = arith.constant 8 : i32
    %c0_43 = arith.constant 0 : index
    %c0_44 = arith.constant 0 : index
    %186 = vector.load %arg5[%c0_43, %c0_44] : memref<1x32xf32, #tpu.memory_space<vmem>>, vector<1x32xf32>
    %cst_45 = arith.constant dense<0.000000e+00> : vector<1x8xf32>
    %187 = tpu.matmul %186, %185, %cst_45 {dimension_numbers = #tpu.dot_dimension_numbers<[1], [1], [0], [0], [0, 0, 1, 0], [], []>} : vector<1x32xf32>, vector<8x32xf32>, vector<1x8xf32> -> vector<1x8xf32>
    %c0_46 = arith.constant 0 : index
    %c0_47 = arith.constant 0 : index
    %c0_48 = arith.constant 0 : index
    %188 = vector.load %arg6[%c0_46, %c0_47, %c0_48] : memref<1x1x8xf32, #tpu.memory_space<vmem>>, vector<1x1x8xf32>
    %189 = vector.shape_cast %188 : vector<1x1x8xf32> to vector<1x8xf32>
    %190 = vector.shape_cast %187 : vector<1x8xf32> to vector<1x1x8xf32>
    tpu.vector_store %arg6[%c0_46, %c0_47, %c0_48], %190 {strides = array<i32>} : memref<1x1x8xf32, #tpu.memory_space<vmem>>, vector<1x1x8xf32>,
    return
  }
  func.func @transform_0(%arg0: i32) -> (i32, i32) {
    %c0_i32 = arith.constant 0 : i32
    %c0_i32_0 = arith.constant 0 : i32
    return %arg0, %c0_i32 : i32, i32
  }
  func.func @transform_1(%arg0: i32) -> (i32, i32) {
    %c0_i32 = arith.constant 0 : i32
    %c0_i32_0 = arith.constant 0 : i32
    %c0_i32_1 = arith.constant 0 : i32
    return %c0_i32, %c0_i32_0 : i32, i32
  }
  func.func @transform_2(%arg0: i32) -> (i32, i32) {
    %c0_i32 = arith.constant 0 : i32
    %c0_i32_0 = arith.constant 0 : i32
    %c0_i32_1 = arith.constant 0 : i32
    return %c0_i32, %c0_i32_0 : i32, i32
  }
  func.func @transform_3(%arg0: i32) -> (i32, i32) {
    %c0_i32 = arith.constant 0 : i32
    %c0_i32_0 = arith.constant 0 : i32
    %c0_i32_1 = arith.constant 0 : i32
    return %c0_i32, %c0_i32_0 : i32, i32
  }
  func.func @transform_4(%arg0: i32) -> (i32, i32) {
    %c0_i32 = arith.constant 0 : i32
    %c0_i32_0 = arith.constant 0 : i32
    %c0_i32_1 = arith.constant 0 : i32
    return %c0_i32, %c0_i32_0 : i32, i32
  }
  func.func @transform_5(%arg0: i32) -> (i32, i32, i32) {
    %c0_i32 = arith.constant 0 : i32
    %c0_i32_0 = arith.constant 0 : i32
    %c0_i32_1 = arith.constant 0 : i32
    return %arg0, %c0_i32, %c0_i32_0 : i32, i32, i32
  }
}

</mosaic_0001>

<bundles_post_ra>
// kernel: tpu_custom_call.1
= control target key start
LH: loop header
LB: loop body
LE: loop exit
PB: predicated region body
PF: predicated region fallthrough
CT: control target
= control target key end

     0   :  { %vm62_vm0 = vcmask 1043456   ;;  %v1419_v3 = vmov 0.0|0.0   ;;  %vm37_vm1 = vcmask 31744   ;;  %s1639_s0 = inlined_call_operand.vmem [shape: f32[64,4], index: 0, kind: input, shape index: {}]   ;;  %s1640_s1 = inlined_call_operand.vmem [shape: f32[4,128], index: 1, kind: input, shape index: {}]   ;;  %s1641_s2 = inlined_call_operand.vmem [shape: f32[32,128], index: 2, kind: input, shape index: {}]   ;;  %s1642_s3 = inlined_call_operand.vmem [shape: f32[1,128], index: 3, kind: input, shape index: {}]   ;;  %s1643_s4 = inlined_call_operand.vmem [shape: f32[1,32], index: 4, kind: input, shape index: {}]   ;;  %s1644_s5 = inlined_call_operand.hbm [shape: f32[1,1,8], index: 5, kind: output, shape index: {}]  }
   0x1   :  { %v179_v0 = vld [vmem:[%s1641_s2] sm:$0xff]  ;;  %v180_v1 = vld [vmem:[%s1641_s2 + $0x8] sm:$0xff]  ;;  %1277 = vmatprep.subr.bf16.mxu1 %v1419_v3  ;;  %v181_v7 = vld [vmem:[%s1641_s2 + $0x10] sm:$0xff] }
   0x2   :  { %v29_v2 = vld [vmem:[%s1640_s1] sm:$0xf]  ;;  %v1465_v4 = vpack.c.bf16 %v180_v1, %v179_v0  ;;  %v22_v6 = vld [vmem:[%s1639_s0 + $0x8] sm:$0xff]  ;;  %v182_v8 = vld [vmem:[%s1641_s2 + $0x18] sm:$0xff] }
   0x3   :  { %1170 = vmatprep.subr.msk.mxu0 %vm62_vm0, %v29_v2  ;;  %v21_v5 = vld [vmem:[%s1639_s0] sm:$0xff] }
   0x4   :  { %1171 = vmatpush3.msk.msra.mxu0 %vm62_vm0, %v29_v2  ;;  %1172 = vmatprep.mubr.msk.f32.mxu0 %vm37_vm1, %v21_v5 }
   0x5   :  { %10 = vsyncpa [#allocation4], 0  ;;  %1279 = vmatpush3.bf16.msra.mxu1 %v1465_v4  ;;  %1173 = vmatmul.mubr.msk.f32.vlgmr.msra.gmra.mrb[0].mxu0 %vm37_vm1, %v22_v6  ;;  %v1482_v9 = vpack.c.bf16 %v182_v8, %v181_v7  ;;  %vm1420_vm2 = vmmov 0   ;;  %v1421_v10 = vmov 0.0   ;;  %v1504_v12 = vld [vmem:[%s1642_s3] ss:$0 sm:$0xff] }
   0x6   :  { %1280 = vmatprep.subr.bf16.mxu1 %v1419_v3  ;;  %1192 = vmatprep.mubr.msk.f32.mxu1 %vm1420_vm2, %v1421_v10  ;;  %s1422_s7 = smov 32   ;;  %s1423_s3 = smov 64   ;;  %vm184_vm3 = vcmask 261120   ;;  %v23_v46 = vld [vmem:[%s1639_s0 + $0x10] sm:$0xff]  ;;  %v24_v47 = vld [vmem:[%s1639_s0 + $0x18] sm:$0xff]  ;;  %v25_v48 = vld [vmem:[%s1639_s0 + $0x20] sm:$0xff] }
   0x7   :  { %1289 = vmatprep.subr.bf16.mxu0 %v1419_v3  ;;  %1175 = vmatprep.mubr.msk.f32.mxu0 %vm37_vm1, %v23_v46  ;;  %v26_v49 = vld [vmem:[%s1639_s0 + $0x28] sm:$0xff]  ;;  %v27_v50 = vld [vmem:[%s1639_s0 + $0x30] sm:$0xff]  ;;  %v28_v51 = vld [vmem:[%s1639_s0 + $0x38] sm:$0xff]  ;;  %s1424_s21 = smov [#allocation3]   ;;  %vm1076_vm4 = vcmask 57344  }
   0x8   :  { %1291 = vmatpush3.bf16.msra.mxu0 %v1465_v4  ;;  %s1084_s22 = sshll.u32 %s1424_s21, 4  ;;  %s1085_s22 = int_to_ptr.vmem [resolvable:$true] %s1084_s22 }
   0x9   :  { %1282 = vmatpush3.bf16.msra.mxu1 %v1482_v9  ;;  %1292 = vmatprep.subr.bf16.mxu0 %v1419_v3  ;;  %s1395_s23 = scalar_lea.vmem %s1085_s22, 16  ;;  %s1399_s24 = scalar_lea.vmem %s1085_s22, 32 }
   0xa   :  { %1283 = vmatprep.subr.bf16.mxu1 %v1419_v3  ;;  %1176 = vmatmul.mubr.msk.f32.gmra.mrb[2].mxu0 %vm37_vm1, %v24_v47  ;;  %p1396_p0 = scmp.ne.s32.totalorder %s1085_s22, %s1395_s23  ;;  %p1400_p1 = scmp.lt.s32.totalorder %s1085_s22, %s1085_s22 }
   0xb   :  { %1178 = vmatprep.mubr.msk.f32.mxu0 %vm37_vm1, %v25_v48  ;;  %p1401_p2 = scmp.lt.s32.totalorder %s1399_s24, %s1395_s23 }
   0xc   :  { %1193 = vmatmul.mubr.f32.vlgmr.msra.gmra.mrb[0].mxu1 %v1421_v10  ;;  %1294 = vmatpush3.bf16.msra.mxu0 %v1482_v9 }
   0xd   :  { %1285 = vmatpush3.bf16.msra.mxu1 %v1465_v4  ;;  %1203 = vmatprep.mubr.msk.f32.mxu1 %vm1420_vm2, %v1421_v10  ;;  %p1402_p3 = por %p1401_p2, %p1400_p1 }
   0xe   :  { %1286 = vmatprep.subr.bf16.mxu1 %v1419_v3  ;;  %1301 = vmatprep.subr.bf16.mxu0 %v1419_v3 }
   0xf   :  { %1179 = vmatmul.mubr.msk.f32.gmra.mrb[4].mxu0 %vm37_vm1, %v26_v49  ;;  %p1403_p4 = pnand %p1402_p3, %p1396_p0 }
  0x10   :  { %1181 = vmatprep.mubr.msk.f32.mxu0 %vm37_vm1, %v27_v50 }
  0x11   :  { %1288 = vmatpush3.bf16.msra.mxu1 %v1482_v9 }
  0x12   :  { %1295 = vmatprep.subr.bf16.mxu1 %v1419_v3 }
  0x13   :  { %1182 = vmatmul.mubr.msk.f32.gmra.mrb[6].mxu0 %vm37_vm1, %v28_v51 }
  0x14   :  { %1214 = vmatprep.mubr.msk.f32.mxu0 %vm1420_vm2, %v1421_v10 }
  0xd8   :  { %v1174_v11 = vpop.f32.mrb[0].mxu0 }
  0xd9   :  { %v132_v13 = vpop.f32.mrb[1].mxu0  ;;  %v138_v32 = vadd.f32 %v1174_v11, %v1504_v12 }
  0xda   :  { %v133_v14 = vadd.f32 %v1504_v12, %v132_v13 }
  0xdd   :  { %v1177_v55 = vpop.f32.mrb[2].mxu0 }
  0xde   :  { %v142_v56 = vpop.f32.mrb[3].mxu0 }
  0xdf   :  { %v254_v15 = vpop.f32.mrb[0].mxu1  ;;  %v143_v62 = vadd.f32 %v1504_v12, %v142_v56 }
  0xe0   :  { %v258_v16 = vadd.f32 %v254_v15, %v133_v14  ;;  %v1194_v17 = vpop.f32.mrb[1].mxu1 }
  0xe2   :  { %1331 = vtanh.f32 %v258_v16  ;;  %v1102_v19 = vmul.f32 -1.442695, %v258_v16  ;;  %v1549_v57 = vpop.f32.mrb[4].mxu0 }
  0xe3   :  { %v1551_v58 = vpop.f32.mrb[5].mxu0 }
  0xe4   :  { %1333 = vpow2.f32 %v1102_v19 }
  0xe6   :  { %v1553_v59 = vpop.f32.mrb[6].mxu0 }
  0xe7   :  { %v1555_v60 = vpop.f32.mrb[7].mxu0 }
  0xec   :  { %v1332_v18 = vpop.eup %1331 }
  0xed   :  { %268 = vrot.lane.b32.xlu0 %v1332_v18, %s1422_s7 }
  0xee   :  { %v1334_v20 = vpop.eup %1333 }
  0xef   :  { %v262_v21 = vadd.f32 1.0, %v1334_v20 }
  0xf1   :  { %1335 = vrcp.f32 %v262_v21  ;;  %v148_v21 = vadd.f32 %v1177_v55, %v1504_v12 }
  0xfb   :  { %v1336_v22 = vpop.eup %1335 }
  0xfc   :  { %v266_v25 = vmul.f32 0.0, %v1336_v22 }
 0x15f   :  { %v269_v23 = vpop.permute.xlu0 %268 }
 0x160   :  { %v271_v24 = vmul.f32 %v1336_v22, %v269_v23 }
 0x162   :  { %273 = vrot.lane.b32.xlu0 %v271_v24, %s1422_s7 }
 0x1d4   :  { %v274_v26 = vpop.permute.xlu0 %273 }
 0x1d5   :  { %v276_v27 = vadd.f32 %v274_v26, %v266_v25 }
 0x1d7   :  { %1337 = vtanh.f32 %v276_v27 }
 0x1e1   :  { %v1338_v28 = vpop.eup %1337 }
 0x1e2   :  { %279 = vrot.lane.b32.xlu1 %v1338_v28, %s1422_s7 }
 0x254   :  { %v280_v29 = vpop.permute.xlu1 %279 }
 0x255   :  { %v282_v30 = vmul.f32 %v1336_v22, %v280_v29 }
 0x257   :  { %286 = vrot.lane.b32.xlu1 %v282_v30, %s1423_s3 }
 0x2c9   :  { %v287_v31 = vpop.permute.xlu1 %286 }
 0x2ca   :  { %1204 = vmatmul.mubr.msk.f32.vlgmr.msra.gmra.mrb[2].mxu1 %vm184_vm3, %v287_v31 }
 0x2cb   :  { %1297 = vmatpush3.bf16.msra.mxu1 %v1465_v4  ;;  %1225 = vmatprep.mubr.msk.f32.mxu1 %vm1420_vm2, %v1421_v10 }
 0x2cc   :  { %1298 = vmatprep.subr.bf16.mxu1 %v1419_v3 }
 0x2cf   :  { %1300 = vmatpush3.bf16.msra.mxu1 %v1482_v9 }
 0x2d0   :  { %1307 = vmatprep.subr.bf16.mxu1 %v1419_v3 }
 0x39d   :  { %v356_v33 = vpop.f32.mrb[2].mxu1 }
 0x39e   :  { %v360_v34 = vadd.f32 %v356_v33, %v138_v32  ;;  %v1205_v35 = vpop.f32.mrb[3].mxu1 }
 0x3a0   :  { %1339 = vtanh.f32 %v360_v34  ;;  %v1104_v37 = vmul.f32 -1.442695, %v360_v34 }
 0x3a2   :  { %1341 = vpow2.f32 %v1104_v37 }
 0x3aa   :  { %v1340_v36 = vpop.eup %1339 }
 0x3ab   :  { %370 = vrot.lane.b32.xlu0 %v1340_v36, %s1422_s7 }
 0x3ac   :  { %v1342_v38 = vpop.eup %1341 }
 0x3ad   :  { %v364_v39 = vadd.f32 1.0, %v1342_v38 }
 0x3af   :  { %1343 = vrcp.f32 %v364_v39  ;;  %v153_v39 = vadd.f32 %v1504_v12, %v1551_v58  ;;  %v158_v58 = vadd.f32 %v1549_v57, %v1504_v12 }
 0x3b9   :  { %v1344_v40 = vpop.eup %1343 }
 0x3ba   :  { %v368_v43 = vmul.f32 %v1344_v40, %v276_v27 }
 0x41d   :  { %v371_v41 = vpop.permute.xlu0 %370 }
 0x41e   :  { %v373_v42 = vmul.f32 %v1344_v40, %v371_v41 }
 0x420   :  { %375 = vrot.lane.b32.xlu1 %v373_v42, %s1422_s7 }
 0x492   :  { %v376_v44 = vpop.permute.xlu1 %375 }
 0x493   :  { %v378_v45 = vadd.f32 %v376_v44, %v368_v43 }
 0x495   :  { %1345 = vtanh.f32 %v378_v45 }
 0x49f   :  { %v1346_v52 = vpop.eup %1345 }
 0x4a0   :  { %381 = vrot.lane.b32.xlu0 %v1346_v52, %s1422_s7 }
 0x512   :  { %v382_v53 = vpop.permute.xlu0 %381 }
 0x513   :  { %v384_v54 = vmul.f32 %v1344_v40, %v382_v53 }
 0x515   :  { %388 = vrot.lane.b32.xlu1 %v384_v54, %s1423_s3 }
 0x587   :  { %v389_v61 = vpop.permute.xlu1 %388 }
 0x588   :  { %1215 = vmatmul.mubr.msk.f32.vlgmr.msra.gmra.mrb[8].mxu0 %vm184_vm3, %v389_v61 }
 0x589   :  { %1303 = vmatpush3.bf16.msra.mxu0 %v1465_v4  ;;  %1236 = vmatprep.mubr.msk.f32.mxu0 %vm1420_vm2, %v1421_v10 }
 0x58a   :  { %1304 = vmatprep.subr.bf16.mxu0 %v1419_v3 }
 0x58d   :  { %1306 = vmatpush3.bf16.msra.mxu0 %v1482_v9 }
 0x58e   :  { %1313 = vmatprep.subr.bf16.mxu0 %v1419_v3 }
 0x65b   :  { %v458_v63 = vpop.f32.mrb[8].mxu0 }
 0x65c   :  { %v462_v0 = vadd.f32 %v458_v63, %v143_v62  ;;  %v1216_v1 = vpop.f32.mrb[9].mxu0 }
 0x65e   :  { %1347 = vtanh.f32 %v462_v0  ;;  %v1106_v5 = vmul.f32 -1.442695, %v462_v0 }
 0x660   :  { %1349 = vpow2.f32 %v1106_v5 }
 0x668   :  { %v1348_v2 = vpop.eup %1347 }
 0x669   :  { %472 = vrot.lane.b32.xlu0 %v1348_v2, %s1422_s7 }
 0x66a   :  { %v1350_v6 = vpop.eup %1349 }
 0x66b   :  { %v466_v7 = vadd.f32 1.0, %v1350_v6 }
 0x66d   :  { %1351 = vrcp.f32 %v466_v7 }
 0x677   :  { %v1352_v8 = vpop.eup %1351 }
 0x678   :  { %v470_v14 = vmul.f32 %v1352_v8, %v378_v45 }
 0x6db   :  { %v473_v11 = vpop.permute.xlu0 %472 }
 0x6dc   :  { %v475_v13 = vmul.f32 %v1352_v8, %v473_v11 }
 0x6de   :  { %477 = vrot.lane.b32.xlu1 %v475_v13, %s1422_s7 }
 0x750   :  { %v478_v15 = vpop.permute.xlu1 %477 }
 0x751   :  { %v480_v16 = vadd.f32 %v478_v15, %v470_v14  ;;  %v163_v15 = vadd.f32 %v1504_v12, %v1555_v60 }
 0x753   :  { %1353 = vtanh.f32 %v480_v16 }
 0x75d   :  { %v1354_v17 = vpop.eup %1353 }
 0x75e   :  { %483 = vrot.lane.b32.xlu0 %v1354_v17, %s1422_s7 }
 0x7d0   :  { %v484_v18 = vpop.permute.xlu0 %483 }
 0x7d1   :  { %v486_v19 = vmul.f32 %v1352_v8, %v484_v18 }
 0x7d3   :  { %490 = vrot.lane.b32.xlu1 %v486_v19, %s1423_s3 }
 0x845   :  { %v491_v20 = vpop.permute.xlu1 %490 }
 0x846   :  { %1226 = vmatmul.mubr.msk.f32.vlgmr.msra.gmra.mrb[4].mxu1 %vm184_vm3, %v491_v20 }
 0x847   :  { %1309 = vmatpush3.bf16.msra.mxu1 %v1465_v4  ;;  %1247 = vmatprep.mubr.msk.f32.mxu1 %vm1420_vm2, %v1421_v10 }
 0x848   :  { %1310 = vmatprep.subr.bf16.mxu1 %v1419_v3 }
 0x84b   :  { %1312 = vmatpush3.bf16.msra.mxu1 %v1482_v9 }
 0x84c   :  { %1319 = vmatprep.subr.bf16.mxu1 %v1419_v3 }
 0x919   :  { %v560_v22 = vpop.f32.mrb[4].mxu1 }
 0x91a   :  { %v564_v23 = vadd.f32 %v560_v22, %v148_v21  ;;  %v1227_v24 = vpop.f32.mrb[5].mxu1 }
 0x91c   :  { %1355 = vtanh.f32 %v564_v23  ;;  %v1108_v26 = vmul.f32 -1.442695, %v564_v23 }
 0x91e   :  { %1357 = vpow2.f32 %v1108_v26 }
 0x926   :  { %v1356_v25 = vpop.eup %1355 }
 0x927   :  { %574 = vrot.lane.b32.xlu0 %v1356_v25, %s1422_s7 }
 0x928   :  { %v1358_v27 = vpop.eup %1357 }
 0x929   :  { %v568_v28 = vadd.f32 1.0, %v1358_v27 }
 0x92b   :  { %1359 = vrcp.f32 %v568_v28 }
 0x935   :  { %v1360_v29 = vpop.eup %1359 }
 0x936   :  { %v572_v32 = vmul.f32 %v1360_v29, %v480_v16 }
 0x999   :  { %v575_v30 = vpop.permute.xlu0 %574 }
 0x99a   :  { %v577_v31 = vmul.f32 %v1360_v29, %v575_v30 }
 0x99c   :  { %579 = vrot.lane.b32.xlu1 %v577_v31, %s1422_s7  ;;  %v168_v31 = vadd.f32 %v1553_v59, %v1504_v12 }
 0xa0e   :  { %v580_v33 = vpop.permute.xlu1 %579 }
 0xa0f   :  { %v582_v34 = vadd.f32 %v580_v33, %v572_v32 }
 0xa11   :  { %1361 = vtanh.f32 %v582_v34 }
 0xa1b   :  { %v1362_v35 = vpop.eup %1361 }
 0xa1c   :  { %585 = vrot.lane.b32.xlu0 %v1362_v35, %s1422_s7 }
 0xa8e   :  { %v586_v36 = vpop.permute.xlu0 %585 }
 0xa8f   :  { %v588_v37 = vmul.f32 %v1360_v29, %v586_v36 }
 0xa91   :  { %592 = vrot.lane.b32.xlu1 %v588_v37, %s1423_s3 }
 0xb03   :  { %v593_v38 = vpop.permute.xlu1 %592 }
 0xb04   :  { %1237 = vmatmul.mubr.msk.f32.vlgmr.msra.gmra.mrb[10].mxu0 %vm184_vm3, %v593_v38 }
 0xb05   :  { %1315 = vmatpush3.bf16.msra.mxu0 %v1465_v4  ;;  %1258 = vmatprep.mubr.msk.f32.mxu0 %vm1420_vm2, %v1421_v10 }
 0xb06   :  { %1316 = vmatprep.subr.bf16.mxu0 %v1419_v3 }
 0xb09   :  { %1318 = vmatpush3.bf16.msra.mxu0 %v1482_v9 }
 0xb0a   :  { %1272 = vmatprep.subr.mxu0 %v1421_v10 }
 0xbd7   :  { %v662_v40 = vpop.f32.mrb[10].mxu0 }
 0xbd8   :  { %v666_v41 = vadd.f32 %v662_v40, %v153_v39  ;;  %v1238_v42 = vpop.f32.mrb[11].mxu0 }
 0xbda   :  { %1363 = vtanh.f32 %v666_v41  ;;  %v1110_v44 = vmul.f32 -1.442695, %v666_v41 }
 0xbdc   :  { %1365 = vpow2.f32 %v1110_v44 }
 0xbe4   :  { %v1364_v43 = vpop.eup %1363 }
 0xbe5   :  { %676 = vrot.lane.b32.xlu0 %v1364_v43, %s1422_s7 }
 0xbe6   :  { %v1366_v45 = vpop.eup %1365 }
 0xbe7   :  { %v670_v46 = vadd.f32 1.0, %v1366_v45 }
 0xbe9   :  { %1367 = vrcp.f32 %v670_v46 }
 0xbf3   :  { %v1368_v47 = vpop.eup %1367 }
 0xbf4   :  { %v674_v50 = vmul.f32 %v1368_v47, %v582_v34 }
 0xc57   :  { %v677_v48 = vpop.permute.xlu0 %676 }
 0xc58   :  { %v679_v49 = vmul.f32 %v1368_v47, %v677_v48 }
 0xc5a   :  { %681 = vrot.lane.b32.xlu1 %v679_v49, %s1422_s7 }
 0xccc   :  { %v682_v51 = vpop.permute.xlu1 %681 }
 0xccd   :  { %v684_v52 = vadd.f32 %v682_v51, %v674_v50 }
 0xccf   :  { %1369 = vtanh.f32 %v684_v52 }
 0xcd9   :  { %v1370_v53 = vpop.eup %1369 }
 0xcda   :  { %687 = vrot.lane.b32.xlu0 %v1370_v53, %s1422_s7 }
 0xd4c   :  { %v688_v54 = vpop.permute.xlu0 %687 }
 0xd4d   :  { %v690_v55 = vmul.f32 %v1368_v47, %v688_v54  ;;  %v997_v47 = vld [vmem:[%s1643_s4] sm:$0x1] }
 0xd4f   :  { %694 = vrot.lane.b32.xlu1 %v690_v55, %s1423_s3 }
 0xdc1   :  { %v695_v56 = vpop.permute.xlu1 %694 }
 0xdc2   :  { %1248 = vmatmul.mubr.msk.f32.vlgmr.msra.gmra.mrb[6].mxu1 %vm184_vm3, %v695_v56 }
 0xdc3   :  { %1321 = vmatpush3.bf16.msra.mxu1 %v1465_v4  ;;  %1269 = vmatprep.mubr.msk.f32.mxu1 %vm1420_vm2, %v1421_v10 }
 0xdc4   :  { %1322 = vmatprep.subr.bf16.mxu1 %v1419_v3 }
 0xdc7   :  { %1324 = vmatpush3.bf16.msra.mxu1 %v1482_v9 }
 0xe95   :  { %v764_v61 = vpop.f32.mrb[6].mxu1 }
 0xe96   :  { %v768_v62 = vadd.f32 %v764_v61, %v158_v58  ;;  %v1249_v63 = vpop.f32.mrb[7].mxu1 }
 0xe98   :  { %1371 = vtanh.f32 %v768_v62  ;;  %v1112_v1 = vmul.f32 -1.442695, %v768_v62 }
 0xe9a   :  { %1373 = vpow2.f32 %v1112_v1 }
 0xea2   :  { %v1372_v0 = vpop.eup %1371 }
 0xea3   :  { %778 = vrot.lane.b32.xlu0 %v1372_v0, %s1422_s7 }
 0xea4   :  { %v1374_v4 = vpop.eup %1373 }
 0xea5   :  { %v772_v2 = vadd.f32 1.0, %v1374_v4 }
 0xea7   :  { %1375 = vrcp.f32 %v772_v2 }
 0xeb1   :  { %v1376_v5 = vpop.eup %1375 }
 0xeb2   :  { %v776_v9 = vmul.f32 %v1376_v5, %v684_v52 }
 0xf15   :  { %v779_v6 = vpop.permute.xlu0 %778 }
 0xf16   :  { %v781_v3 = vmul.f32 %v1376_v5, %v779_v6 }
 0xf18   :  { %783 = vrot.lane.b32.xlu1 %v781_v3, %s1422_s7 }
 0xf8a   :  { %v784_v7 = vpop.permute.xlu1 %783 }
 0xf8b   :  { %v786_v57 = vadd.f32 %v784_v7, %v776_v9 }
 0xf8d   :  { %1377 = vtanh.f32 %v786_v57 }
 0xf97   :  { %v1378_v8 = vpop.eup %1377 }
 0xf98   :  { %789 = vrot.lane.b32.xlu0 %v1378_v8, %s1422_s7 }
0x100a   :  { %v790_v11 = vpop.permute.xlu0 %789 }
0x100b   :  { %v792_v13 = vmul.f32 %v1376_v5, %v790_v11 }
0x100d   :  { %796 = vrot.lane.b32.xlu1 %v792_v13, %s1423_s3 }
0x107f   :  { %v797_v14 = vpop.permute.xlu1 %796 }
0x1080   :  { %1259 = vmatmul.mubr.msk.f32.vlgmr.msra.gmra.mrb[12].mxu0 %vm184_vm3, %v797_v14 }
0x1081   :  { %1274 = vmatprep.mubr.msk.f32.mxu0 %vm1420_vm2, %v1421_v10 }
0x1153   :  { %v866_v16 = vpop.f32.mrb[12].mxu0 }
0x1154   :  { %v870_v17 = vadd.f32 %v866_v16, %v163_v15  ;;  %v1260_v18 = vpop.f32.mrb[13].mxu0 }
0x1156   :  { %1379 = vtanh.f32 %v870_v17  ;;  %v1114_v20 = vmul.f32 -1.442695, %v870_v17 }
0x1158   :  { %1381 = vpow2.f32 %v1114_v20 }
0x1160   :  { %v1380_v19 = vpop.eup %1379 }
0x1161   :  { %880 = vrot.lane.b32.xlu0 %v1380_v19, %s1422_s7 }
0x1162   :  { %v1382_v21 = vpop.eup %1381 }
0x1163   :  { %v874_v22 = vadd.f32 1.0, %v1382_v21 }
0x1165   :  { %1383 = vrcp.f32 %v874_v22 }
0x116f   :  { %v1384_v23 = vpop.eup %1383 }
0x1170   :  { %v878_v10 = vmul.f32 %v1384_v23, %v786_v57 }
0x11d3   :  { %v881_v24 = vpop.permute.xlu0 %880 }
0x11d4   :  { %v883_v25 = vmul.f32 %v1384_v23, %v881_v24 }
0x11d6   :  { %885 = vrot.lane.b32.xlu1 %v883_v25, %s1422_s7 }
0x1248   :  { %v886_v26 = vpop.permute.xlu1 %885 }
0x1249   :  { %v888_v60 = vadd.f32 %v886_v26, %v878_v10 }
0x124b   :  { %1385 = vtanh.f32 %v888_v60 }
0x1255   :  { %v1386_v27 = vpop.eup %1385 }
0x1256   :  { %891 = vrot.lane.b32.xlu0 %v1386_v27, %s1422_s7 }
0x12c8   :  { %v892_v28 = vpop.permute.xlu0 %891 }
0x12c9   :  { %v894_v29 = vmul.f32 %v1384_v23, %v892_v28 }
0x12cb   :  { %898 = vrot.lane.b32.xlu1 %v894_v29, %s1423_s3 }
0x133d   :  { %v899_v30 = vpop.permute.xlu1 %898 }
0x133e   :  { %1270 = vmatmul.mubr.msk.f32.vlgmr.msra.gmra.mrb[8].mxu1 %vm184_vm3, %v899_v30 }
0x1411   :  { %v968_v32 = vpop.f32.mrb[8].mxu1 }
0x1412   :  { %v972_v33 = vadd.f32 %v968_v32, %v168_v31  ;;  %v1271_v34 = vpop.f32.mrb[9].mxu1 }
0x1414   :  { %1387 = vtanh.f32 %v972_v33  ;;  %v1116_v36 = vmul.f32 -1.442695, %v972_v33 }
0x1416   :  { %1389 = vpow2.f32 %v1116_v36 }
0x141e   :  { %v1388_v35 = vpop.eup %1387 }
0x141f   :  { %982 = vrot.lane.b32.xlu0 %v1388_v35, %s1422_s7 }
0x1420   :  { %v1390_v37 = vpop.eup %1389 }
0x1421   :  { %v976_v38 = vadd.f32 1.0, %v1390_v37 }
0x1423   :  { %1391 = vrcp.f32 %v976_v38 }
0x142d   :  { %v1392_v39 = vpop.eup %1391 }
0x142e   :  { %v980_v42 = vmul.f32 %v1392_v39, %v888_v60 }
0x1491   :  { %v983_v40 = vpop.permute.xlu0 %982 }
0x1492   :  { %v985_v41 = vmul.f32 %v1392_v39, %v983_v40 }
0x1494   :  { %987 = vrot.lane.b32.xlu1 %v985_v41, %s1422_s7 }
0x1506   :  { %v988_v43 = vpop.permute.xlu1 %987 }
0x1507   :  { %v990_v12 = vadd.f32 %v988_v43, %v980_v42 }
0x1509   :  { %1393 = vtanh.f32 %v990_v12 }
0x1513   :  { %v1394_v59 = vpop.eup %1393 }
0x1514   :  { %993 = vrot.lane.b32.xlu0 %v1394_v59, %s1422_s7 }
0x1586   :  { %v994_v44 = vpop.permute.xlu0 %993 }
0x1587   :  { %v996_v45 = vmul.f32 %v1392_v39, %v994_v44 }
0x1589   :  { %999 = vrot.lane.b32.xlu1 %v996_v45, %s1423_s3 }
0x15fb   :  { %v1000_v46 = vpop.permute.xlu1 %999 }
0x15fc   :  { %1273 = vmatpush3.xpose.msk.msra.mxu0 %vm184_vm3, %v1000_v46 }
0x15ff   :  { %1275 = vmatmul.mubr.msk.f32.vlgmr.msra.gmra.mrb[14].mxu0 %vm184_vm3, %v997_v47 }
0x16d2   :  { %v1072_v48 = vpop.f32.mrb[14].mxu0 }
0x16d3   :  { %1077 = vst.msk [vmem:[#allocation3] sm:$0x1] %vm1076_vm4, %v1072_v48  ;;  %v1276_v49 = vpop.f32.mrb[15].mxu0 }
0x16d4   :  { %1406 = shalt.err (!%p1403_p4)
}
0x16d5   :  { %s1407_s4 = scalar_lea.hbm %s1644_s5, 16 }
0x16d6   :  { %p1408_p5 = scmp.ne.s32.totalorder %s1644_s5, %s1407_s4  ;;  %p1411_p6 = scmp.lt.u32.totalorder %s1407_s4, %s1644_s5 }
0x16d8   :  { %p1413_p7 = pnand %p1411_p6, %p1408_p5 }
0x16da   :  { %1416 = shalt.err (!%p1413_p7)
}
0x16db   :  { %1087 = dma.vmem_to_hbm [thread:$0]  %s1085_s22, 16, %s1644_s5, [#allocation4]  }
0x16dc   :  { %1417 = dma.done.wait [#allocation4], 16  }
0x16dd   :  { %1418 = vsyncadd [#allocation4], 4294967280 }
0x16de   :  { %1091 = vsyncpa [#allocation4], 1 }

</bundles_post_ra>
